<compile_context>
chip_gen: v7x
topology: tpu7x:2x2x1
jax: 0.10.0
libtpu: 0.0.40
codegen_flags: <defaults>
</compile_context>

<pallas_src>
from functools import partial

import jax
import jax.numpy as jnp
from jax.experimental import pallas as pl
from jax.experimental.pallas import tpu as pltpu


def _round_up(n, m):
    return ((n + m - 1) // m) * m


def _vmem_capacity_bytes(default=64 * 1024 * 1024):
    """Physical VMEM of the attached TPU; conservative fallback (v7x size)."""
    try:
        cap = pltpu.get_tpu_info().vmem_capacity_bytes
        if cap and cap > 0:
            return int(cap)
    except Exception:
        pass
    return default


def _fcnet_fused_kernel(*refs, n_layers, relu_flags, out_pads):
    """refs = (x_ref, bias_all_ref, w0_ref, ..., w{L-1}_ref, o_ref).

    Weights/biases are whole (padded) arrays resident in VMEM across grid
    steps; x/out are batch tiles. Intermediate activations live purely in
    values (vregs) — only the final layer writes.
    """
    x_ref = refs[0]
    b_ref = refs[1]            # (L, Dmax_pad) f32, all biases packed
    w_refs = refs[2:2 + n_layers]
    o_ref = refs[2 + n_layers]

    h = x_ref[...].astype(jnp.float32)
    for li in range(n_layers):
        w = w_refs[li][...]                               # bf16 (Din_p, Dout_p)
        acc = jnp.dot(h.astype(w.dtype), w,
                      preferred_element_type=jnp.float32)  # f32 MXU accumulate
        bias = b_ref[li:li + 1, :out_pads[li]]             # (1, Dout_p) f32
        h = acc + bias                                     # f32 VPU
        if relu_flags[li]:
            h = jnp.maximum(h, 0.0)
    o_ref[...] = h.astype(o_ref.dtype)


def _fcnet_fused_call(x_pad, weights, bias_all, out_pads, relu_flags, tm):
    """Single pallas_call; batch-tiled grid, resident weights."""
    Bp, Din_p = x_pad.shape
    Dout_p = out_pads[-1]
    n_layers = len(weights)
    grid = (Bp // tm,)

    in_specs = [
        pl.BlockSpec((tm, Din_p), lambda i: (i, 0)),        # x: batch tile
        pl.BlockSpec(bias_all.shape, lambda i: (0, 0)),     # packed biases
    ]
    for w in weights:
        in_specs.append(pl.BlockSpec(w.shape, lambda i: (0, 0)))  # resident
    out_spec = pl.BlockSpec((tm, Dout_p), lambda i: (i, 0))

    # --- VMEM budget derived from actual padded sizes (not hardcoded). ---
    def nbytes(a):
        return int(a.size) * a.dtype.itemsize

    weight_bytes = sum(nbytes(w) for w in weights)
    io_bytes = 2 * (tm * Din_p * 4 + tm * Dout_p * 4)       # double-buffered x/out
    bias_bytes = 2 * nbytes(bias_all)
    act_bytes = 4 * tm * max([Din_p] + list(out_pads)) * 4  # intermediate h slack
    needed = 2 * weight_bytes + io_bytes + bias_bytes + act_bytes + (4 << 20)
    vmem_limit = int(min(max(needed, 32 * 1024 * 1024),
                         0.9 * _vmem_capacity_bytes()))

    # --- Advisory cost estimate for XLA's scheduler. ---
    flops = 0
    k = Din_p
    for dop in out_pads:
        flops += 2 * Bp * k * dop
        k = dop
    bytes_accessed = (nbytes(x_pad) + weight_bytes + nbytes(bias_all)
                      + Bp * Dout_p * 4)

    kernel = partial(
        _fcnet_fused_kernel,
        n_layers=n_layers,
        relu_flags=tuple(relu_flags),
        out_pads=tuple(out_pads),
    )
    return pl.pallas_call(
        kernel,
        out_shape=jax.ShapeDtypeStruct((Bp, Dout_p), jnp.float32),
        grid=grid,
        in_specs=in_specs,
        out_specs=out_spec,
        compiler_params=pltpu.CompilerParams(
            dimension_semantics=("parallel",),
            vmem_limit_bytes=vmem_limit,
        ),
        cost_estimate=pl.CostEstimate(
            flops=flops, transcendentals=0, bytes_accessed=bytes_accessed),
    )(x_pad, bias_all, *weights)


def init_fcnet_params(key, input_size, fc_layer_dims, output_dim):
    """Deterministic synthetic params in logical shapes: (W [in,out], b [out]).
    W is stored as PyTorch W.T so the kernel does a plain x @ W matmul."""
    params = []
    in_size = input_size
    dims = list(fc_layer_dims) + [output_dim]
    for layer_dim in dims:
        key, kw, kb = jax.random.split(key, 3)
        bound = 1.0 / jnp.sqrt(jnp.float32(in_size))  # torch Linear default-ish
        w = jax.random.uniform(kw, (in_size, layer_dim), jnp.float32, -bound, bound)
        b = jax.random.uniform(kb, (layer_dim,), jnp.float32, -bound, bound)
        params.append((w, b))
        in_size = layer_dim
    return params


def pad_fcnet_params(params, lane_multiple=128, weight_dtype=jnp.bfloat16):
    """Prepare kernel-side parameters once, up front:
      * every feature dim zero-padded to a multiple of `lane_multiple`
        (128; 256 is preferable for very wide layers on v6e/v7x),
      * weights cast to bf16 (MXU-native, half the DMA/VMEM bytes),
      * all biases packed into ONE (L, Dmax_pad) f32 array (one DMA).
    Zero-padded rows/cols stay inert through Linear+ReLU chains."""
    w_list = []
    out_pads = []
    for (w, b) in params:
        din, dout = w.shape
        din_p = _round_up(din, lane_multiple)
        dout_p = _round_up(dout, lane_multiple)
        wp = (jnp.zeros((din_p, dout_p), jnp.float32)
              .at[:din, :dout].set(w)).astype(weight_dtype)
        w_list.append(wp)
        out_pads.append(dout_p)

    dmax = max(out_pads)
    bias_all = jnp.zeros((len(params), dmax), jnp.float32)
    for li, (_, b) in enumerate(params):
        bias_all = bias_all.at[li, :b.shape[0]].set(b)

    return {
        "weights": tuple(w_list),
        "bias_all": bias_all,
        "out_pads": tuple(out_pads),
        "in_pad": _round_up(params[0][0].shape[0], lane_multiple),
    }


def fcnet_forward(x, packed, output_dim, *,
                  activation_relu=True, last_layer_activation_relu=True,
                  batch_tile=256):
    """FCNet forward on [B, Din] inputs using the single fused kernel.

    For many small forward passes, stack them in the caller so B (and hence
    the batch tile) is >=128/256 rows before calling this — amortizes launch
    and weight DMA and fills the MXU rows.
    """
    B, Din = x.shape
    tm = min(_round_up(max(B, 1), 8), batch_tile)   # sublane-aligned batch tile
    Bp = _round_up(max(B, 1), tm)
    Din_p = packed["in_pad"]
    x_pad = jnp.zeros((Bp, Din_p), jnp.float32).at[:B, :Din].set(
        x.astype(jnp.float32))

    n = len(packed["weights"])
    relu_flags = [activation_relu] * (n - 1) + [last_layer_activation_relu]

    out_pad = _fcnet_fused_call(x_pad, packed["weights"], packed["bias_all"],
                                packed["out_pads"], relu_flags, tm)
    return out_pad[:B, :output_dim]


if __name__ == "__main__":
    key = jax.random.PRNGKey(0)
    batch = 4
    input_size = 16
    fc_layer_dims = (32, 32)
    output_dim = 8

    kx, kp = jax.random.split(key)
    x = jax.random.normal(kx, (batch, input_size), jnp.float32)
    params = init_fcnet_params(kp, input_size, fc_layer_dims, output_dim)
    packed = pad_fcnet_params(params)

    out = fcnet_forward(x, packed, output_dim)
    out = jax.block_until_ready(out)

    # Pure-JAX reference with matching numerics: bf16 matmul inputs, f32
    # accumulation, f32 bias + ReLU (every layer incl. the last uses ReLU,
    # matching activation='relu', last_layer_activation='relu').
    ref = x
    for (w, b) in params:
        ref = jnp.dot(ref.astype(jnp.bfloat16), w.astype(jnp.bfloat16),
                      preferred_element_type=jnp.float32) + b
        ref = jnp.maximum(ref, 0.0)

    assert out.shape == (batch, output_dim)
    assert jnp.allclose(out, ref, atol=1e-3, rtol=1e-3)

    print("KERNEL_OK")
</pallas_src>

<mosaic_0001>
module attributes {stable_mosaic.version = 11 : i64} {
  func.func @_fcnet_fused_kernel(%arg0: i32, %arg1: memref<8x128xf32, #tpu.memory_space<vmem>>, %arg2: memref<3x128xf32, #tpu.memory_space<vmem>>, %arg3: memref<128x128xbf16, #tpu.memory_space<vmem>>, %arg4: memref<128x128xbf16, #tpu.memory_space<vmem>>, %arg5: memref<128x128xbf16, #tpu.memory_space<vmem>>, %arg6: memref<8x128xf32, #tpu.memory_space<vmem>>) attributes {dimension_semantics = [#tpu.dimension_semantics<parallel>], iteration_bounds = array<i64: 1>, scalar_prefetch = 0 : i64, scratch_operands = 0 : i64, tpu.core_type = #tpu.core_type<tc>, window_params = [{transform_indices = @transform_0, window_bounds = array<i64: 8, 128>}, {pipeline_mode = #tpu.pipeline_mode<synchronous>, transform_indices = @transform_1, window_bounds = array<i64: 3, 128>}, {pipeline_mode = #tpu.pipeline_mode<synchronous>, transform_indices = @transform_2, window_bounds = array<i64: 128, 128>}, {pipeline_mode = #tpu.pipeline_mode<synchronous>, transform_indices = @transform_3, window_bounds = array<i64: 128, 128>}, {pipeline_mode = #tpu.pipeline_mode<synchronous>, transform_indices = @transform_4, window_bounds = array<i64: 128, 128>}, {transform_indices = @transform_5, window_bounds = array<i64: 8, 128>}]} {
    %c0 = arith.constant 0 : index
    %c0_0 = arith.constant 0 : index
    %0 = vector.load %arg1[%c0, %c0_0] : memref<8x128xf32, #tpu.memory_space<vmem>>, vector<8x128xf32>
    %c0_1 = arith.constant 0 : index
    %c0_2 = arith.constant 0 : index
    %1 = vector.load %arg3[%c0_1, %c0_2] : memref<128x128xbf16, #tpu.memory_space<vmem>>, vector<128x128xbf16>
    %2 = arith.truncf %0 : vector<8x128xf32> to vector<8x128xbf16>
    %cst = arith.constant dense<0.000000e+00> : vector<8x128xf32>
    %3 = tpu.matmul %2, %1, %cst {dimension_numbers = #tpu.dot_dimension_numbers<[1], [0], [0], [1], [0, 0, 1, 1], [], []>} : vector<8x128xbf16>, vector<128x128xbf16>, vector<8x128xf32> -> vector<8x128xf32>
    %c0_3 = arith.constant 0 : index
    %c0_4 = arith.constant 0 : index
    %4 = vector.load %arg2[%c0_3, %c0_4] : memref<3x128xf32, #tpu.memory_space<vmem>>, vector<1x128xf32>
    %5 = vector.broadcast %4 : vector<1x128xf32> to vector<8x128xf32>
    %6 = arith.addf %3, %5 : vector<8x128xf32>
    %cst_5 = arith.constant 0.000000e+00 : f32
    %7 = vector.broadcast %cst_5 : f32 to vector<8x128xf32>
    %8 = arith.maximumf %6, %7 : vector<8x128xf32>
    %c0_6 = arith.constant 0 : index
    %c0_7 = arith.constant 0 : index
    %9 = vector.load %arg4[%c0_6, %c0_7] : memref<128x128xbf16, #tpu.memory_space<vmem>>, vector<128x128xbf16>
    %10 = arith.truncf %8 : vector<8x128xf32> to vector<8x128xbf16>
    %cst_8 = arith.constant dense<0.000000e+00> : vector<8x128xf32>
    %11 = tpu.matmul %10, %9, %cst_8 {dimension_numbers = #tpu.dot_dimension_numbers<[1], [0], [0], [1], [0, 0, 1, 1], [], []>} : vector<8x128xbf16>, vector<128x128xbf16>, vector<8x128xf32> -> vector<8x128xf32>
    %c1 = arith.constant 1 : index
    %c0_9 = arith.constant 0 : index
    %12 = vector.load %arg2[%c1, %c0_9] : memref<3x128xf32, #tpu.memory_space<vmem>>, vector<1x128xf32>
    %13 = vector.broadcast %12 : vector<1x128xf32> to vector<8x128xf32>
    %14 = arith.addf %11, %13 : vector<8x128xf32>
    %cst_10 = arith.constant 0.000000e+00 : f32
    %15 = vector.broadcast %cst_10 : f32 to vector<8x128xf32>
    %16 = arith.maximumf %14, %15 : vector<8x128xf32>
    %c0_11 = arith.constant 0 : index
    %c0_12 = arith.constant 0 : index
    %17 = vector.load %arg5[%c0_11, %c0_12] : memref<128x128xbf16, #tpu.memory_space<vmem>>, vector<128x128xbf16>
    %18 = arith.truncf %16 : vector<8x128xf32> to vector<8x128xbf16>
    %cst_13 = arith.constant dense<0.000000e+00> : vector<8x128xf32>
    %19 = tpu.matmul %18, %17, %cst_13 {dimension_numbers = #tpu.dot_dimension_numbers<[1], [0], [0], [1], [0, 0, 1, 1], [], []>} : vector<8x128xbf16>, vector<128x128xbf16>, vector<8x128xf32> -> vector<8x128xf32>
    %c2 = arith.constant 2 : index
    %c0_14 = arith.constant 0 : index
    %20 = vector.load %arg2[%c2, %c0_14] : memref<3x128xf32, #tpu.memory_space<vmem>>, vector<1x128xf32>
    %21 = vector.broadcast %20 : vector<1x128xf32> to vector<8x128xf32>
    %22 = arith.addf %19, %21 : vector<8x128xf32>
    %cst_15 = arith.constant 0.000000e+00 : f32
    %23 = vector.broadcast %cst_15 : f32 to vector<8x128xf32>
    %24 = arith.maximumf %22, %23 : vector<8x128xf32>
    %c0_16 = arith.constant 0 : index
    %c0_17 = arith.constant 0 : index
    %25 = vector.load %arg6[%c0_16, %c0_17] : memref<8x128xf32, #tpu.memory_space<vmem>>, vector<8x128xf32>
    tpu.vector_store %arg6[%c0_16, %c0_17], %24 {strides = array<i32>} : memref<8x128xf32, #tpu.memory_space<vmem>>, vector<8x128xf32>,
    return
  }
  func.func @transform_0(%arg0: i32) -> (i32, i32) {
    %c0_i32 = arith.constant 0 : i32
    %c0_i32_0 = arith.constant 0 : i32
    return %arg0, %c0_i32 : i32, i32
  }
  func.func @transform_1(%arg0: i32) -> (i32, i32) {
    %c0_i32 = arith.constant 0 : i32
    %c0_i32_0 = arith.constant 0 : i32
    %c0_i32_1 = arith.constant 0 : i32
    return %c0_i32, %c0_i32_0 : i32, i32
  }
  func.func @transform_2(%arg0: i32) -> (i32, i32) {
    %c0_i32 = arith.constant 0 : i32
    %c0_i32_0 = arith.constant 0 : i32
    %c0_i32_1 = arith.constant 0 : i32
    return %c0_i32, %c0_i32_0 : i32, i32
  }
  func.func @transform_3(%arg0: i32) -> (i32, i32) {
    %c0_i32 = arith.constant 0 : i32
    %c0_i32_0 = arith.constant 0 : i32
    %c0_i32_1 = arith.constant 0 : i32
    return %c0_i32, %c0_i32_0 : i32, i32
  }
  func.func @transform_4(%arg0: i32) -> (i32, i32) {
    %c0_i32 = arith.constant 0 : i32
    %c0_i32_0 = arith.constant 0 : i32
    %c0_i32_1 = arith.constant 0 : i32
    return %c0_i32, %c0_i32_0 : i32, i32
  }
  func.func @transform_5(%arg0: i32) -> (i32, i32) {
    %c0_i32 = arith.constant 0 : i32
    %c0_i32_0 = arith.constant 0 : i32
    return %arg0, %c0_i32 : i32, i32
  }
}

</mosaic_0001>

<bundles_post_ra>
// kernel: tpu_custom_call.1
= control target key start
LH: loop header
LB: loop body
LE: loop exit
PB: predicated region body
PF: predicated region fallthrough
CT: control target
= control target key end

     0   :  { %10 = vsyncpa [#allocation3], 0  ;;  %s877_s0 = inlined_call_operand.hbm [shape: f32[8,128], index: 0, kind: input, shape index: {}]   ;;  %s878_s1 = inlined_call_operand.hbm [shape: f32[3,128], index: 1, kind: input, shape index: {}]   ;;  %s879_s2 = inlined_call_operand.hbm [shape: bf16[128,128], index: 2, kind: input, shape index: {}]   ;;  %s880_s3 = inlined_call_operand.hbm [shape: bf16[128,128], index: 3, kind: input, shape index: {}]   ;;  %s881_s4 = inlined_call_operand.hbm [shape: bf16[128,128], index: 4, kind: input, shape index: {}]   ;;  %s882_s5 = inlined_call_operand.hbm [shape: f32[8,128], index: 5, kind: output, shape index: {}]  }
   0x1   :  { %11 = vsyncpa [#allocation6], 0 }
   0x2   :  { %12 = vsyncpa [#allocation9], 0 }
   0x3   :  { %13 = vsyncpa [#allocation4], 0  ;;  %s726_s18 = smov [#allocation5]   ;;  %s586_s22 = scalar_lea.hbm %s878_s1, 64 }
   0x4   :  { %s30_s19 = sshll.u32 %s726_s18, 4  ;;  %p587_p0 = scmp.ne.s32.totalorder %s878_s1, %s586_s22  ;;  %s31_s19 = int_to_ptr.vmem [resolvable:$true] %s30_s19 }
   0x5   :  { %p590_p1 = scmp.lt.u32.totalorder %s586_s22, %s878_s1 }
   0x7   :  { %p592_p2 = pnand %p590_p1, %p587_p0 }
   0x9   :  { %595 = shalt.err (!%p592_p2)
}
   0xa   :  { %s596_s27 = scalar_lea.vmem %s31_s19, 64  ;;  %p601_p4 = scmp.lt.s32.totalorder %s31_s19, %s31_s19 }
   0xb   :  { %p597_p3 = scmp.ne.s32.totalorder %s31_s19, %s596_s27  ;;  %p602_p5 = scmp.lt.s32.totalorder %s596_s27, %s596_s27 }
   0xd   :  { %p603_p6 = por %p602_p5, %p601_p4 }
   0xf   :  { %p604_p7 = pnand %p603_p6, %p597_p3 }
  0x11   :  { %607 = shalt.err (!%p604_p7)
}
  0x12   :  { %33 = dma.hbm_to_vmem [thread:$0]  %s878_s1, 64, %s31_s19, [#allocation6]  }
  0x13   :  { %s727_s30 = smov [#allocation8]   ;;  %s728_s7 = smov [#allocation2]  }
  0x14   :  { %s51_s6 = sshll.u32 %s727_s30, 4  ;;  %s20_s8 = sshll.u32 %s728_s7, 4  ;;  %s52_s6 = int_to_ptr.vmem [resolvable:$true] %s51_s6  ;;  %s21_s8 = int_to_ptr.vmem [resolvable:$true] %s20_s8 }
  0x15   :  { %s608_s11 = scalar_lea.hbm %s880_s3, 1024 }
  0x16   :  { %p609_p8 = scmp.ne.s32.totalorder %s880_s3, %s608_s11  ;;  %p612_p9 = scmp.lt.u32.totalorder %s608_s11, %s880_s3 }
  0x18   :  { %p614_p10 = pnand %p612_p9, %p609_p8 }
  0x1a   :  { %617 = shalt.err (!%p614_p10)
}
  0x1b   :  { %s618_s1 = scalar_lea.vmem %s52_s6, 1024  ;;  %p623_p12 = scmp.lt.s32.totalorder %s52_s6, %s52_s6 }
  0x1c   :  { %p619_p11 = scmp.ne.s32.totalorder %s52_s6, %s618_s1  ;;  %p624_p13 = scmp.lt.s32.totalorder %s618_s1, %s618_s1 }
  0x1e   :  { %p625_p0 = por %p624_p13, %p623_p12 }
  0x20   :  { %p626_p1 = pnand %p625_p0, %p619_p11 }
  0x22   :  { %629 = shalt.err (!%p626_p1)
}
  0x23   :  { %s729_s16 = smov 64   ;;  %s730_s17 = smov 4  }
  0x24   :  { %57 = dma.hbm_to_vmem [thread:$0]  %s880_s3, 1024, %s52_s6, [#allocation9], %s729_s16, %s729_s16, %s730_s17  }
  0x25   :  { %s630_s22 = scalar_lea.hbm %s877_s0, 128 }
  0x26   :  { %p631_p2 = scmp.ne.s32.totalorder %s877_s0, %s630_s22  ;;  %p634_p3 = scmp.lt.u32.totalorder %s630_s22, %s877_s0 }
  0x28   :  { %p636_p4 = pnand %p634_p3, %p631_p2 }
  0x2a   :  { %639 = shalt.err (!%p636_p4)
}
  0x2b   :  { %s640_s27 = scalar_lea.vmem %s21_s8, 128  ;;  %p645_p6 = scmp.lt.s32.totalorder %s21_s8, %s21_s8 }
  0x2c   :  { %p641_p5 = scmp.ne.s32.totalorder %s21_s8, %s640_s27  ;;  %p646_p7 = scmp.lt.s32.totalorder %s640_s27, %s640_s27 }
  0x2e   :  { %p647_p8 = por %p646_p7, %p645_p6 }
  0x30   :  { %p648_p9 = pnand %p647_p8, %p641_p5 }
  0x32   :  { %651 = shalt.err (!%p648_p9)
}
  0x33   :  { %23 = dma.hbm_to_vmem [thread:$0]  %s877_s0, 128, %s21_s8, [#allocation3]  }
  0x34   :  { %s731_s29 = smov [#allocation7]   ;;  %s732_s6 = smov [#allocation10]  }
  0x35   :  { %s39_s30 = sshll.u32 %s731_s29, 4  ;;  %s63_s7 = sshll.u32 %s732_s6, 4  ;;  %s40_s30 = int_to_ptr.vmem [resolvable:$true] %s39_s30  ;;  %s64_s7 = int_to_ptr.vmem [resolvable:$true] %s63_s7 }
  0x36   :  { %s652_s11 = scalar_lea.hbm %s879_s2, 1024 }
  0x37   :  { %p653_p10 = scmp.ne.s32.totalorder %s879_s2, %s652_s11  ;;  %p656_p11 = scmp.lt.u32.totalorder %s652_s11, %s879_s2 }
  0x39   :  { %p658_p12 = pnand %p656_p11, %p653_p10 }
  0x3b   :  { %661 = shalt.err (!%p658_p12)
}
  0x3c   :  { %s662_s0 = scalar_lea.vmem %s40_s30, 1024  ;;  %p667_p0 = scmp.lt.s32.totalorder %s40_s30, %s40_s30 }
  0x3d   :  { %p663_p13 = scmp.ne.s32.totalorder %s40_s30, %s662_s0  ;;  %p668_p1 = scmp.lt.s32.totalorder %s662_s0, %s662_s0 }
  0x3f   :  { %p669_p2 = por %p668_p1, %p667_p0 }
  0x41   :  { %p670_p3 = pnand %p669_p2, %p663_p13 }
  0x43   :  { %673 = shalt.err (!%p670_p3)
}
  0x44   :  { %45 = dma.hbm_to_vmem [thread:$0]  %s879_s2, 1024, %s40_s30, [#allocation6], %s729_s16, %s729_s16, %s730_s17  }
  0x45   :  { %s674_s20 = scalar_lea.hbm %s881_s4, 1024 }
  0x46   :  { %p675_p4 = scmp.ne.s32.totalorder %s881_s4, %s674_s20  ;;  %p678_p5 = scmp.lt.u32.totalorder %s674_s20, %s881_s4 }
  0x48   :  { %p680_p6 = pnand %p678_p5, %p675_p4 }
  0x4a   :  { %683 = shalt.err (!%p680_p6)
}
  0x4b   :  { %s684_s25 = scalar_lea.vmem %s64_s7, 1024  ;;  %p689_p8 = scmp.lt.s32.totalorder %s64_s7, %s64_s7 }
  0x4c   :  { %p685_p7 = scmp.ne.s32.totalorder %s64_s7, %s684_s25  ;;  %p690_p9 = scmp.lt.s32.totalorder %s684_s25, %s684_s25 }
  0x4e   :  { %p691_p10 = por %p690_p9, %p689_p8 }
  0x50   :  { %p692_p11 = pnand %p691_p10, %p685_p7 }
  0x52   :  { %695 = shalt.err (!%p692_p11)
}
  0x53   :  { %69 = dma.hbm_to_vmem [thread:$0]  %s881_s4, 1024, %s64_s7, [#allocation9], %s729_s16, %s729_s16, %s730_s17  }
  0x54   :  { %718 = dma.done.wait [#allocation3], 128  }
  0x55   :  { %719 = vsyncadd [#allocation3], 4294967168 }
  0x56   :  { %720 = dma.done.wait [#allocation6], 1088  }
  0x57   :  { %721 = vsyncadd [#allocation6], 4294966208 }
  0x58   :  { %722 = dma.done.wait [#allocation9], 2048  }
  0x59   :  { %723 = vsyncadd [#allocation9], 4294965248  ;;  %v733_v0 = vmov 0.0   ;;  %vm734_vm0 = vmmov 0   ;;  %v562_v1 = vld [vmem:[#allocation7] sm:$0xff]   ;;  %v563_v2 = vld [vmem:[#allocation7 + $0x8] sm:$0xff]  }
  0x5a   :  { %492 = vmatprep.subr.bf16.mxu0 %v733_v0  ;;  %508 = vmatprep.mubr.msk.bf16.mxu0 %vm734_vm0, %v733_v0  ;;  %v564_v3 = vld [vmem:[#allocation7 + $0x10] sm:$0xff]   ;;  %v570_v4 = vld [vmem:[#allocation8] sm:$0xff]   ;;  %v565_v5 = vld [vmem:[#allocation7 + $0x18] sm:$0xff]   ;;  %s735_s4 = smov [#allocation11]  }
  0x5b   :  { %512 = vmatprep.subr.bf16.mxu1 %v733_v0  ;;  %528 = vmatprep.mubr.msk.bf16.mxu1 %vm734_vm0, %v733_v0  ;;  %v571_v6 = vld [vmem:[#allocation8 + $0x8] sm:$0xff]   ;;  %v566_v7 = vld [vmem:[#allocation7 + $0x20] sm:$0xff]   ;;  %v572_v8 = vld [vmem:[#allocation8 + $0x10] sm:$0xff]   ;;  %s427_s16 = sshll.u32 %s735_s4, 4  ;;  %s428_s16 = int_to_ptr.vmem [resolvable:$true] %s427_s16 }
  0x5c   :  { %493 = vmatpush3.bf16.msra.mxu0 %v562_v1  ;;  %513 = vmatpush3.bf16.msra.mxu1 %v570_v4  ;;  %v567_v9 = vld [vmem:[#allocation7 + $0x28] sm:$0xff]   ;;  %v573_v10 = vld [vmem:[#allocation8 + $0x18] sm:$0xff]   ;;  %v568_v11 = vld [vmem:[#allocation7 + $0x30] sm:$0xff]   ;;  %s696_s17 = scalar_lea.vmem %s428_s16, 128  ;;  %p701_p13 = scmp.lt.s32.totalorder %s428_s16, %s428_s16 }
  0x5d   :  { %494 = vmatprep.subr.bf16.mxu0 %v733_v0  ;;  %514 = vmatprep.subr.bf16.mxu1 %v733_v0  ;;  %v574_v12 = vld [vmem:[#allocation8 + $0x20] sm:$0xff]   ;;  %v569_v13 = vld [vmem:[#allocation7 + $0x38] sm:$0xff]   ;;  %v575_v15 = vld [vmem:[#allocation8 + $0x28] sm:$0xff]   ;;  %p697_p12 = scmp.ne.s32.totalorder %s428_s16, %s696_s17  ;;  %p702_p0 = scmp.lt.s32.totalorder %s696_s17, %s696_s17 }
  0x5e   :  { %v86_v14 = vld [vmem:[#allocation2] sm:$0xff]  ;;  %v578_v19 = vld [vmem:[#allocation10] sm:$0xff]   ;;  %v579_v20 = vld [vmem:[#allocation10 + $0x8] sm:$0xff]  }
  0x5f   :  { %v103_v16 = vpack.c.bf16 %v86_v14, %v86_v14  ;;  %v576_v17 = vld [vmem:[#allocation8 + $0x30] sm:$0xff]   ;;  %v577_v18 = vld [vmem:[#allocation8 + $0x38] sm:$0xff]   ;;  %v582_v23 = vld [vmem:[#allocation10 + $0x20] sm:$0xff]   ;;  %p703_p1 = por %p702_p0, %p701_p13 }
  0x60   :  { %495 = vmatpush3.bf16.msra.mxu0 %v563_v2  ;;  %515 = vmatpush3.bf16.msra.mxu1 %v571_v6  ;;  %v580_v21 = vld [vmem:[#allocation10 + $0x10] sm:$0xff]   ;;  %v581_v22 = vld [vmem:[#allocation10 + $0x18] sm:$0xff]   ;;  %v583_v24 = vld [vmem:[#allocation10 + $0x28] sm:$0xff]  }
  0x61   :  { %496 = vmatprep.subr.bf16.mxu0 %v733_v0  ;;  %516 = vmatprep.subr.bf16.mxu1 %v733_v0  ;;  %v438_v25 = vld [vmem:[#allocation5] ss:$0 sm:$0xff]  ;;  %v584_v33 = vld [vmem:[#allocation10 + $0x30] sm:$0xff]   ;;  %v447_v35 = vld [vmem:[#allocation5 + $0x1] ss:$0 sm:$0xff]  ;;  %p704_p2 = pnand %p703_p1, %p697_p12 }
  0x62   :  { %v585_v34 = vld [vmem:[#allocation10 + $0x38] sm:$0xff]  }
  0x63   :  { %v456_v43 = vld [vmem:[#allocation5 + $0x2] ss:$0 sm:$0xff] }
  0x64   :  { %497 = vmatpush3.bf16.msra.mxu0 %v564_v3  ;;  %517 = vmatpush3.bf16.msra.mxu1 %v572_v8 }
  0x65   :  { %498 = vmatprep.subr.bf16.mxu0 %v733_v0  ;;  %518 = vmatprep.subr.bf16.mxu1 %v733_v0 }
  0x68   :  { %499 = vmatpush3.bf16.msra.mxu0 %v565_v5  ;;  %519 = vmatpush3.bf16.msra.mxu1 %v573_v10 }
  0x69   :  { %500 = vmatprep.subr.bf16.mxu0 %v733_v0  ;;  %520 = vmatprep.subr.bf16.mxu1 %v733_v0 }
  0x6c   :  { %501 = vmatpush3.bf16.msra.mxu0 %v566_v7  ;;  %521 = vmatpush3.bf16.msra.mxu1 %v574_v12 }
  0x6d   :  { %502 = vmatprep.subr.bf16.mxu0 %v733_v0  ;;  %522 = vmatprep.subr.bf16.mxu1 %v733_v0 }
  0x70   :  { %503 = vmatpush3.bf16.msra.mxu0 %v567_v9  ;;  %523 = vmatpush3.bf16.msra.mxu1 %v575_v15 }
  0x71   :  { %504 = vmatprep.subr.bf16.mxu0 %v733_v0  ;;  %524 = vmatprep.subr.bf16.mxu1 %v733_v0 }
  0x74   :  { %505 = vmatpush3.bf16.msra.mxu0 %v568_v11  ;;  %525 = vmatpush3.bf16.msra.mxu1 %v576_v17 }
  0x75   :  { %506 = vmatprep.subr.bf16.mxu0 %v733_v0  ;;  %526 = vmatprep.subr.bf16.mxu1 %v733_v0 }
  0x78   :  { %507 = vmatpush3.bf16.msra.mxu0 %v569_v13  ;;  %527 = vmatpush3.bf16.msra.mxu1 %v577_v18 }
  0x79   :  { %532 = vmatprep.subr.bf16.mxu0 %v733_v0 }
  0x7b   :  { %509 = vmatmul.mubr.bf16.vlgmr.msra.gmra.mrb[0].mxu0 %v103_v16 }
  0x7c   :  { %548 = vmatprep.mubr.msk.bf16.mxu0 %vm734_vm0, %v733_v0  ;;  %533 = vmatpush3.bf16.msra.mxu0 %v578_v19 }
  0x7d   :  { %534 = vmatprep.subr.bf16.mxu0 %v733_v0 }
  0x80   :  { %535 = vmatpush3.bf16.msra.mxu0 %v579_v20 }
  0x81   :  { %536 = vmatprep.subr.bf16.mxu0 %v733_v0 }
  0x84   :  { %537 = vmatpush3.bf16.msra.mxu0 %v580_v21 }
  0x85   :  { %538 = vmatprep.subr.bf16.mxu0 %v733_v0 }
  0x88   :  { %539 = vmatpush3.bf16.msra.mxu0 %v581_v22 }
  0x89   :  { %540 = vmatprep.subr.bf16.mxu0 %v733_v0 }
  0x8c   :  { %541 = vmatpush3.bf16.msra.mxu0 %v582_v23 }
  0x8d   :  { %542 = vmatprep.subr.bf16.mxu0 %v733_v0 }
  0x90   :  { %543 = vmatpush3.bf16.msra.mxu0 %v583_v24 }
  0x91   :  { %544 = vmatprep.subr.bf16.mxu0 %v733_v0 }
  0x94   :  { %545 = vmatpush3.bf16.msra.mxu0 %v584_v33 }
  0x95   :  { %546 = vmatprep.subr.bf16.mxu0 %v733_v0 }
  0x98   :  { %547 = vmatpush3.bf16.msra.mxu0 %v585_v34 }
 0x14e   :  { %v191_v26 = vpop.f32.mrb[0].mxu0 }
 0x14f   :  { %v192_v27 = vadd.f32 %v438_v25, %v191_v26  ;;  %v510_v28 = vpop.f32.mrb[1].mxu0 }
 0x150   :  { %v194_v29 = vpop.f32.mrb[2].mxu0 }
 0x151   :  { %v197_v30 = vmax.f32 %v192_v27, 0.0  ;;  %v511_v31 = vpop.f32.mrb[3].mxu0 }
 0x153   :  { %v214_v32 = vpack.c.bf16 %v197_v30, %v197_v30 }
 0x155   :  { %529 = vmatmul.mubr.bf16.vlgmr.msra.gmra.mrb[0].mxu1 %v214_v32 }
 0x228   :  { %v302_v36 = vpop.f32.mrb[0].mxu1 }
 0x229   :  { %v303_v37 = vadd.f32 %v447_v35, %v302_v36  ;;  %v530_v38 = vpop.f32.mrb[1].mxu1 }
 0x22a   :  { %v305_v39 = vpop.f32.mrb[2].mxu1 }
 0x22b   :  { %v308_v40 = vmax.f32 %v303_v37, 0.0  ;;  %v531_v41 = vpop.f32.mrb[3].mxu1 }
 0x22d   :  { %v325_v42 = vpack.c.bf16 %v308_v40, %v308_v40 }
 0x22f   :  { %549 = vmatmul.mubr.bf16.vlgmr.msra.gmra.mrb[4].mxu0 %v325_v42 }
 0x302   :  { %v413_v44 = vpop.f32.mrb[4].mxu0 }
 0x303   :  { %v414_v45 = vadd.f32 %v456_v43, %v413_v44  ;;  %v550_v46 = vpop.f32.mrb[5].mxu0 }
 0x304   :  { %v416_v47 = vpop.f32.mrb[6].mxu0 }
 0x305   :  { %v419_v48 = vmax.f32 %v414_v45, 0.0  ;;  %v551_v49 = vpop.f32.mrb[7].mxu0 }
 0x307   :  { %420 = vst [vmem:[#allocation11] sm:$0xff] %v419_v48 }
 0x308   :  { %707 = shalt.err (!%p704_p2)
}
 0x309   :  { %s708_s28 = scalar_lea.hbm %s882_s5, 128 }
 0x30a   :  { %p709_p3 = scmp.ne.s32.totalorder %s882_s5, %s708_s28  ;;  %p712_p4 = scmp.lt.u32.totalorder %s708_s28, %s882_s5 }
 0x30c   :  { %p714_p5 = pnand %p712_p4, %p709_p3 }
 0x30e   :  { %717 = shalt.err (!%p714_p5)
}
 0x30f   :  { %430 = dma.vmem_to_hbm [thread:$0]  %s428_s16, 128, %s882_s5, [#allocation4]  }
 0x310   :  { %724 = dma.done.wait [#allocation4], 128  }
 0x311   :  { %725 = vsyncadd [#allocation4], 4294967168 }
 0x312   :  { %434 = vsyncpa [#allocation3], 1 }
 0x313   :  { %435 = vsyncpa [#allocation6], 1 }
 0x314   :  { %436 = vsyncpa [#allocation9], 1 }
 0x315   :  { %437 = vsyncpa [#allocation4], 1 }

</bundles_post_ra>
